<compile_context>
chip_gen: v6e
topology: v6e:2x2x1
jax: 0.10.0
libtpu: 0.0.40
codegen_flags: <defaults>
</compile_context>

<pallas_src>
import math

import jax
import jax.numpy as jnp
from jax.experimental import pallas as pl
from jax.experimental.pallas import tpu as pltpu


_LANES = 1024  # lane-dense last dim (multiple of 128)


def _ssp_kernel(c_ref, x_ref, o_ref):
    # c_ref: SMEM (4,) f32 = [beta, s1, s2, s3]
    beta = c_ref[0]
    s1 = c_ref[1]
    s2 = c_ref[2]
    s3 = c_ref[3]

    x = x_ref[...].astype(jnp.float32)
    # Stable softplus on the EUP; VPU path is just a few mul/adds.
    y = s1 * jax.nn.softplus(beta * x) + s2 * x - s3
    o_ref[...] = y.astype(o_ref.dtype)


def shifted_softplus(x, alpha, beta, *, target_tile_bytes=2 * 1024 * 1024):
    """Shifted softplus: alpha * where(beta!=0, (softplus(beta*x)-log2)/beta, 0.5*x).

    x: float array of any shape; alpha, beta: python floats or 0-d arrays.
    """
    orig_shape = x.shape
    orig_dtype = x.dtype
    total = x.size
    itemsize = jnp.dtype(orig_dtype).itemsize

    # ---- fold the scalar algebra into 4 SMEM scalars --------------------------
    alpha_f = jnp.asarray(alpha, dtype=jnp.float32).reshape(())
    beta_f = jnp.asarray(beta, dtype=jnp.float32).reshape(())
    nonzero = beta_f != 0
    safe_beta = jnp.where(nonzero, beta_f, jnp.float32(1.0))
    s1 = jnp.where(nonzero, alpha_f / safe_beta, jnp.float32(0.0))  # scale on softplus
    s2 = jnp.where(nonzero, jnp.float32(0.0), 0.5 * alpha_f)        # linear (beta==0) branch
    s3 = s1 * jnp.float32(math.log(2.0))                             # shift
    consts = jnp.stack([beta_f, s1, s2, s3])

    # ---- lane-dense reshape + byte-budgeted row tiling -------------------------
    flat = x.reshape(-1)
    rows = pl.cdiv(total, _LANES)

    # sublane granularity per dtype (f32: 8, bf16: 16, int8/fp8: 32)
    sub = {1: 32, 2: 16, 4: 8}.get(itemsize, 8)

    budget_rows = max(sub, target_tile_bytes // (_LANES * itemsize))
    block_rows = min(budget_rows, rows)
    block_rows = max(sub, (block_rows // sub) * sub)

    padded_rows = pl.cdiv(rows, block_rows) * block_rows
    padded_total = padded_rows * _LANES
    if padded_total != total:
        flat = jnp.pad(flat, (0, padded_total - total))
    x2d = flat.reshape(padded_rows, _LANES)

    grid = (padded_rows // block_rows,)

    out2d = pl.pallas_call(
        _ssp_kernel,
        out_shape=jax.ShapeDtypeStruct((padded_rows, _LANES), orig_dtype),
        grid=grid,
        in_specs=[
            pl.BlockSpec(memory_space=pltpu.SMEM),                      # consts (4,)
            pl.BlockSpec((block_rows, _LANES), lambda i: (i, 0)),        # x tile
        ],
        out_specs=pl.BlockSpec((block_rows, _LANES), lambda i: (i, 0)),
        compiler_params=pltpu.CompilerParams(
            dimension_semantics=("parallel",),          # shards grid across TCs on v7x
            vmem_limit_bytes=32 * 1024 * 1024,          # safe on v5e/v6e/v7x
        ),
    )(consts, x2d)

    return out2d.reshape(-1)[:total].reshape(orig_shape)


def shifted_softplus_ref(x, alpha, beta):
    """Pure-JAX reference matching the PyTorch forward."""
    alpha = jnp.asarray(alpha, dtype=jnp.float32)
    beta = jnp.asarray(beta, dtype=jnp.float32)
    xf = x.astype(jnp.float32)
    z = beta * xf
    sp = jnp.logaddexp(z, 0.0)
    safe_beta = jnp.where(beta != 0, beta, 1.0)
    y = alpha * jnp.where(beta != 0, (sp - math.log(2.0)) / safe_beta, 0.5 * xf)
    return y.astype(x.dtype)


if __name__ == "__main__":
    key = jax.random.PRNGKey(0)

    # x: [:, num_features]  -> small example: batch=8, num_features=32
    x = jax.random.normal(key, (8, 32), dtype=jnp.float32)

    # default params
    y = shifted_softplus(x, 1.0, 1.0)
    jax.block_until_ready(y)
    assert jnp.allclose(y, shifted_softplus_ref(x, 1.0, 1.0), atol=1e-5, rtol=1e-5)

    # beta == 0 branch (identity scaled by 0.5*alpha)
    y0 = shifted_softplus(x, 2.0, 0.0)
    jax.block_until_ready(y0)
    assert jnp.allclose(y0, shifted_softplus_ref(x, 2.0, 0.0), atol=1e-5, rtol=1e-5)

    # ragged / multi-block case: exercises padding + a grid with >1 step
    key2 = jax.random.PRNGKey(1)
    x2 = jax.random.normal(key2, (600, 64), dtype=jnp.float32)
    y2 = shifted_softplus(x2, 1.3, 2.7)
    jax.block_until_ready(y2)
    assert jnp.allclose(y2, shifted_softplus_ref(x2, 1.3, 2.7), atol=1e-5, rtol=1e-5)

    print("KERNEL_OK")
</pallas_src>

<mosaic_0001>
module attributes {stable_mosaic.version = 11 : i64} {
  func.func @_ssp_kernel(%arg0: i32, %arg1: memref<4xf32, #tpu.memory_space<smem>>, %arg2: memref<8x1024xf32, #tpu.memory_space<vmem>>, %arg3: memref<8x1024xf32, #tpu.memory_space<vmem>>) attributes {dimension_semantics = [#tpu.dimension_semantics<parallel>], iteration_bounds = array<i64: 1>, scalar_prefetch = 0 : i64, scratch_operands = 0 : i64, tpu.core_type = #tpu.core_type<tc>, window_params = [{transform_indices = @transform_0, window_bounds = array<i64: 4>}, {transform_indices = @transform_1, window_bounds = array<i64: 8, 1024>}, {transform_indices = @transform_2, window_bounds = array<i64: 8, 1024>}]} {
    %c0 = arith.constant 0 : index
    %0 = memref.load %arg1[%c0] : memref<4xf32, #tpu.memory_space<smem>>
    %c1 = arith.constant 1 : index
    %1 = memref.load %arg1[%c1] : memref<4xf32, #tpu.memory_space<smem>>
    %c2 = arith.constant 2 : index
    %2 = memref.load %arg1[%c2] : memref<4xf32, #tpu.memory_space<smem>>
    %c3 = arith.constant 3 : index
    %3 = memref.load %arg1[%c3] : memref<4xf32, #tpu.memory_space<smem>>
    %c0_0 = arith.constant 0 : index
    %c0_1 = arith.constant 0 : index
    %4 = vector.load %arg2[%c0_0, %c0_1] : memref<8x1024xf32, #tpu.memory_space<vmem>>, vector<8x1024xf32>
    %5 = vector.broadcast %0 : f32 to vector<8x1024xf32>
    %6 = arith.mulf %5, %4 : vector<8x1024xf32>
    %cst = arith.constant 0.000000e+00 : f32
    %7 = vector.broadcast %cst : f32 to vector<8x1024xf32>
    %8 = arith.maximumf %6, %7 : vector<8x1024xf32>
    %9 = vector.broadcast %cst : f32 to vector<8x1024xf32>
    %10 = arith.subf %6, %9 : vector<8x1024xf32>
    %11 = arith.cmpf one, %10, %10 : vector<8x1024xf32>
    %12 = vector.broadcast %cst : f32 to vector<8x1024xf32>
    %13 = arith.addf %6, %12 : vector<8x1024xf32>
    %14 = math.absf %10 : vector<8x1024xf32>
    %cst_2 = arith.constant 0.000000e+00 : f32
    %15 = vector.broadcast %cst_2 : f32 to vector<8x1024xf32>
    %16 = arith.subf %15, %14 : vector<8x1024xf32>
    %17 = math.exp %16 : vector<8x1024xf32>
    %18 = math.log1p %17 : vector<8x1024xf32>
    %19 = arith.addf %8, %18 : vector<8x1024xf32>
    %20 = arith.select %11, %13, %19 : vector<8x1024xi1>, vector<8x1024xf32>
    %21 = vector.broadcast %1 : f32 to vector<8x1024xf32>
    %22 = arith.mulf %21, %20 : vector<8x1024xf32>
    %23 = vector.broadcast %2 : f32 to vector<8x1024xf32>
    %24 = arith.mulf %23, %4 : vector<8x1024xf32>
    %25 = arith.addf %22, %24 : vector<8x1024xf32>
    %26 = vector.broadcast %3 : f32 to vector<8x1024xf32>
    %27 = arith.subf %25, %26 : vector<8x1024xf32>
    %c0_3 = arith.constant 0 : index
    %c0_4 = arith.constant 0 : index
    %28 = vector.load %arg3[%c0_3, %c0_4] : memref<8x1024xf32, #tpu.memory_space<vmem>>, vector<8x1024xf32>
    tpu.vector_store %arg3[%c0_3, %c0_4], %27 {strides = array<i32>} : memref<8x1024xf32, #tpu.memory_space<vmem>>, vector<8x1024xf32>,
    return
  }
  func.func @transform_0(%arg0: i32) -> i32 {
    %c0_i32 = arith.constant 0 : i32
    %c0_i32_0 = arith.constant 0 : i32
    return %c0_i32 : i32
  }
  func.func @transform_1(%arg0: i32) -> (i32, i32) {
    %c0_i32 = arith.constant 0 : i32
    %c0_i32_0 = arith.constant 0 : i32
    return %arg0, %c0_i32 : i32, i32
  }
  func.func @transform_2(%arg0: i32) -> (i32, i32) {
    %c0_i32 = arith.constant 0 : i32
    %c0_i32_0 = arith.constant 0 : i32
    return %arg0, %c0_i32 : i32, i32
  }
}

</mosaic_0001>

<bundles_post_ra>
// kernel: tpu_custom_call.1
= control target key start
LH: loop header
LB: loop body
LE: loop exit
PB: predicated region body
PF: predicated region fallthrough
CT: control target
= control target key end

     0   :  { %7 = vsyncpa [#allocation5], 0  ;;  %s634_s0 = inlined_call_operand.hbm [shape: f32[4], index: 0, kind: input, shape index: {}]   ;;  %s635_s1 = inlined_call_operand.hbm [shape: f32[8,1024], index: 1, kind: input, shape index: {}]   ;;  %s636_s2 = inlined_call_operand.hbm [shape: f32[8,1024], index: 2, kind: output, shape index: {}]  }
   0x1   :  { %8 = vsyncpa [#allocation3], 0 }
   0x2   :  { %9 = vsyncpa [#allocation4], 0  ;;  %s351_s9 = smov [#allocation2]   ;;  %s352_s12 = smov [#allocation6]  }
   0x3   :  { %17 = dma.hbm_to_smem %s634_s0, 16, %s351_s9, [#allocation5]  }
   0x4   :  { %s24_s13 = sshll.u32 %s352_s12, 4  ;;  %s25_s13 = int_to_ptr.vmem [resolvable:$true] %s24_s13 }
   0x5   :  { %s313_s14 = scalar_lea.vmem %s25_s13, 1024  ;;  %p318_p1 = scmp.lt.s32.totalorder %s25_s13, %s25_s13 }
   0x6   :  { %p314_p0 = scmp.ne.s32.totalorder %s25_s13, %s313_s14  ;;  %p319_p2 = scmp.lt.s32.totalorder %s313_s14, %s313_s14 }
   0x8   :  { %p320_p3 = por %p319_p2, %p318_p1 }
   0xa   :  { %p321_p4 = pnand %p320_p3, %p314_p0 }
   0xc   :  { %324 = shalt.err (!%p321_p4)
}
   0xd   :  { %27 = dma.hbm_to_vmem [thread:$0]  %s635_s1, 1024, %s25_s13, [#allocation3]  }
   0xe   :  { %345 = dma.done.wait [#allocation5], 16  }
   0xf   :  { %346 = vsyncadd [#allocation5], 4294967280 }
  0x10   :  { %347 = dma.done.wait [#allocation3], 1024  }
  0x11   :  { %348 = vsyncadd [#allocation3], 4294966272 }
  0x12   :  { %34 = sfence }
  0x13   :  { %s35_s0 = sld [smem:[#allocation2]]  ;;  %v39_v0 = vld [vmem:[#allocation6] sm:$0xff]  ;;  %v375_v1 = vld [vmem:[#allocation6 + $0x8] sm:$0xff]  ;;  %v377_v2 = vld [vmem:[#allocation6 + $0x10] sm:$0xff]  ;;  %s353_s19 = smov [#allocation7]  }
  0x14   :  { %v379_v4 = vld [vmem:[#allocation6 + $0x18] sm:$0xff]  ;;  %v389_v8 = vld [vmem:[#allocation6 + $0x20] sm:$0xff]  ;;  %v396_v12 = vld [vmem:[#allocation6 + $0x28] sm:$0xff]  ;;  %s260_s1 = sld [smem:[#allocation2 + $0x2]]  ;;  %s249_s20 = sshll.u32 %s353_s19, 4  ;;  %s250_s20 = int_to_ptr.vmem [resolvable:$true] %s249_s20 }
  0x15   :  { %v407_v24 = vld [vmem:[#allocation6 + $0x30] sm:$0xff]  ;;  %v409_v25 = vld [vmem:[#allocation6 + $0x38] sm:$0xff]  ;;  %s259_s17 = sld [smem:[#allocation2 + $0x1]]  ;;  %s325_s21 = scalar_lea.vmem %s250_s20, 1024 }
  0x16   :  { %s261_s18 = sld [smem:[#allocation2 + $0x3]]  ;;  %p326_p5 = scmp.ne.s32.totalorder %s250_s20, %s325_s21 }
  0x17   :  { %p330_p6 = scmp.lt.s32.totalorder %s250_s20, %s250_s20  ;;  %p331_p7 = scmp.lt.s32.totalorder %s325_s21, %s325_s21 }
  0x19   :  { %v47_v3 = vstv %s35_s0  ;;  %p332_p8 = por %p331_p7, %p330_p6 }
  0x1a   :  { %v381_v5 = vmul.f32 %v47_v3, %v39_v0  ;;  %v384_v6 = vmul.f32 %v47_v3, %v375_v1  ;;  %v387_v7 = vmul.f32 %v47_v3, %v377_v2  ;;  %v393_v10 = vmul.f32 %v47_v3, %v379_v4 }
  0x1b   :  { %v399_v14 = vmul.f32 %v47_v3, %v389_v8  ;;  %v404_v19 = vmul.f32 %v47_v3, %v396_v12  ;;  %v413_v30 = vmul.f32 %v47_v3, %v407_v24  ;;  %v416_v31 = vmul.f32 %v47_v3, %v409_v25  ;;  %p333_p9 = pnand %p332_p8, %p326_p5 }
  0x1c   :  { %v80_v9 = vand.u32 2147483647, %v381_v5  ;;  %v81_v11 = vand.u32 2147483647, %v384_v6  ;;  %v82_v16 = vand.u32 2147483647, %v387_v7  ;;  %v422_v44 = vstv %s260_s1 }
  0x1d   :  { %v83_v18 = vand.u32 2147483647, %v393_v10  ;;  %v84_v23 = vand.u32 2147483647, %v399_v14  ;;  %v85_v29 = vand.u32 2147483647, %v404_v19  ;;  %v427_v47 = vstv %s259_s17 }
  0x1e   :  { %v88_v13 = vsub.f32 0.0, %v80_v9  ;;  %v89_v15 = vsub.f32 0.0, %v81_v11  ;;  %v90_v21 = vsub.f32 0.0, %v82_v16  ;;  %v86_v34 = vand.u32 2147483647, %v413_v30 }
  0x1f   :  { %v91_v22 = vsub.f32 0.0, %v83_v18  ;;  %v92_v28 = vsub.f32 0.0, %v84_v23  ;;  %v93_v33 = vsub.f32 0.0, %v85_v29  ;;  %v87_v36 = vand.u32 2147483647, %v416_v31 }
  0x20   :  { %v96_v17 = vmul.f32 1.442695, %v88_v13  ;;  %v98_v20 = vmul.f32 1.442695, %v89_v15  ;;  %v100_v26 = vmul.f32 1.442695, %v90_v21  ;;  %v433_v50 = vmul.f32 %v422_v44, %v39_v0 }
  0x21   :  { %v102_v27 = vmul.f32 1.442695, %v91_v22  ;;  %v104_v32 = vmul.f32 1.442695, %v92_v28  ;;  %v106_v35 = vmul.f32 1.442695, %v93_v33  ;;  %v436_v52 = vstv %s261_s18 }
  0x22   :  { %265 = vpow2.f32 %v96_v17  ;;  %v94_v37 = vsub.f32 0.0, %v86_v34  ;;  %v95_v38 = vsub.f32 0.0, %v87_v36  ;;  %v56_v49 = vmax.f32 %v381_v5, 0.0 }
  0x23   :  { %267 = vpow2.f32 %v98_v20  ;;  %v57_v53 = vmax.f32 %v384_v6, 0.0  ;;  %v441_v54 = vmul.f32 %v422_v44, %v375_v1  ;;  %v58_v58 = vmax.f32 %v387_v7, 0.0 }
  0x24   :  { %269 = vpow2.f32 %v100_v26  ;;  %v108_v39 = vmul.f32 1.442695, %v94_v37  ;;  %v110_v40 = vmul.f32 1.442695, %v95_v38  ;;  %v449_v59 = vmul.f32 %v422_v44, %v377_v2 }
  0x25   :  { %271 = vpow2.f32 %v102_v27  ;;  %v59_v60 = vmax.f32 %v393_v10, 0.0  ;;  %v454_v61 = vmul.f32 %v422_v44, %v379_v4  ;;  %v60_v1 = vmax.f32 %v399_v14, 0.0 }
  0x26   :  { %273 = vpow2.f32 %v104_v32  ;;  %v463_v3 = vmul.f32 %v422_v44, %v389_v8  ;;  %v61_v2 = vmax.f32 %v404_v19, 0.0  ;;  %v471_v16 = vmul.f32 %v422_v44, %v396_v12 }
  0x27   :  { %275 = vpow2.f32 %v106_v35  ;;  %v62_v17 = vmax.f32 %v413_v30, 0.0  ;;  %vm64_vm0 = vcmp.ne.f32.partialorder %v381_v5, %v381_v5  ;;  %v63_v21 = vmax.f32 %v416_v31, 0.0 }
  0x28   :  { %277 = vpow2.f32 %v108_v39  ;;  %vm65_vm1 = vcmp.ne.f32.partialorder %v384_v6, %v384_v6  ;;  %vm66_vm3 = vcmp.ne.f32.partialorder %v387_v7, %v387_v7  ;;  %vm67_vm4 = vcmp.ne.f32.partialorder %v393_v10, %v393_v10 }
  0x29   :  { %279 = vpow2.f32 %v110_v40  ;;  %vm68_vm8 = vcmp.ne.f32.partialorder %v399_v14, %v399_v14  ;;  %vm69_vm10 = vcmp.ne.f32.partialorder %v404_v19, %v404_v19  ;;  %vm70_vm12 = vcmp.ne.f32.partialorder %v413_v30, %v413_v30 }
  0x2a   :  { %vm71_vm15 = vcmp.ne.f32.partialorder %v416_v31, %v416_v31 }
  0x2f   :  { %v266_v41 = vpop.eup %265 }
  0x30   :  { %v420_v42 = vpop.eup %267  ;;  %v112_v43 = vadd.f32 1.0, %v266_v41  ;;  %v115_v57 = vmul.f32 -0.5, %v266_v41  ;;  %v118_v9 = vand.u32 2147483647, %v266_v41 }
  0x31   :  { %v121_v45 = vadd.f32 1.0, %v420_v42  ;;  %v425_v46 = vpop.eup %269  ;;  %v124_v0 = vmul.f32 -0.5, %v420_v42  ;;  %v127_v8 = vand.u32 2147483647, %v420_v42 }
  0x32   :  { %281 = vlog2.f32 %v112_v43  ;;  %v429_v48 = vpop.eup %271  ;;  %v130_v51 = vadd.f32 1.0, %v425_v46  ;;  %v133_v11 = vmul.f32 -0.5, %v425_v46  ;;  %v116_v13 = vadd.f32 1.0, %v115_v57 }
  0x33   :  { %283 = vlog2.f32 %v121_v45  ;;  %v139_v55 = vadd.f32 1.0, %v429_v48  ;;  %v444_v56 = vpop.eup %273  ;;  %v142_v15 = vmul.f32 -0.5, %v429_v48  ;;  %v125_v12 = vadd.f32 1.0, %v124_v0 }
  0x34   :  { %285 = vlog2.f32 %v130_v51  ;;  %v148_v62 = vadd.f32 1.0, %v444_v56  ;;  %v457_v63 = vpop.eup %275  ;;  %v151_v20 = vmul.f32 -0.5, %v444_v56  ;;  %v136_v23 = vand.u32 2147483647, %v425_v46 }
  0x35   :  { %287 = vlog2.f32 %v139_v55  ;;  %v157_v4 = vadd.f32 1.0, %v457_v63  ;;  %v278_v18 = vpop.eup %277  ;;  %v145_v26 = vand.u32 2147483647, %v429_v48  ;;  %vm485_vm2 = vcmp.lt.f32.partialorder %v118_v9, 0.0004427343 }
  0x36   :  { %289 = vlog2.f32 %v148_v62  ;;  %v479_v22 = vpop.eup %279  ;;  %v166_v27 = vadd.f32 1.0, %v278_v18  ;;  %v134_v29 = vadd.f32 1.0, %v133_v11  ;;  %v160_v32 = vmul.f32 -0.5, %v457_v63 }
  0x37   :  { %291 = vlog2.f32 %v157_v4  ;;  %v175_v33 = vadd.f32 1.0, %v479_v22  ;;  %v117_v34 = vmul.f32 %v266_v41, %v116_v13  ;;  %v143_v35 = vadd.f32 1.0, %v142_v15 }
  0x38   :  { %293 = vlog2.f32 %v166_v27  ;;  %v169_v36 = vmul.f32 -0.5, %v278_v18  ;;  %v152_v37 = vadd.f32 1.0, %v151_v20  ;;  %v154_v38 = vand.u32 2147483647, %v444_v56 }
  0x39   :  { %v163_v39 = vand.u32 2147483647, %v457_v63  ;;  %295 = vlog2.f32 %v175_v33  ;;  %v126_v43 = vmul.f32 %v420_v42, %v125_v12  ;;  %vm498_vm5 = vcmp.lt.f32.partialorder %v127_v8, 0.0004427343 }
  0x3a   :  { %vm502_vm6 = vcmp.lt.f32.partialorder %v136_v23, 0.0004427343  ;;  %vm506_vm7 = vcmp.lt.f32.partialorder %v145_v26, 0.0004427343  ;;  %v135_v62 = vmul.f32 %v425_v46, %v134_v29  ;;  %v161_v0 = vadd.f32 1.0, %v160_v32 }
  0x3b   :  { %v178_v9 = vmul.f32 -0.5, %v479_v22  ;;  %v144_v11 = vmul.f32 %v429_v48, %v143_v35  ;;  %v170_v4 = vadd.f32 1.0, %v169_v36  ;;  %v172_v13 = vand.u32 2147483647, %v278_v18 }
  0x3c   :  { %v153_v20 = vmul.f32 %v444_v56, %v152_v37  ;;  %vm518_vm9 = vcmp.lt.f32.partialorder %v154_v38, 0.0004427343  ;;  %vm524_vm11 = vcmp.lt.f32.partialorder %v163_v39, 0.0004427343  ;;  %v181_v56 = vand.u32 2147483647, %v479_v22 }
  0x3d   :  { %v162_v32 = vmul.f32 %v457_v63, %v161_v0  ;;  %v179_v33 = vadd.f32 1.0, %v178_v9  ;;  %v171_v36 = vmul.f32 %v278_v18, %v170_v4  ;;  %vm544_vm13 = vcmp.lt.f32.partialorder %v172_v13, 0.0004427343 }
  0x3e   :  { %vm560_vm14 = vcmp.lt.f32.partialorder %v181_v56, 0.0004427343 }
  0x3f   :  { %v282_v40 = vpop.eup %281  ;;  %v180_v51 = vmul.f32 %v479_v22, %v179_v33 }
  0x40   :  { %v284_v55 = vpop.eup %283  ;;  %v114_v57 = vmul.f32 0.6931472, %v282_v40 }
  0x41   :  { %v123_v42 = vmul.f32 0.6931472, %v284_v55  ;;  %v286_v15 = vpop.eup %285 }
  0x42   :  { %v120_v8 = vsel %vm485_vm2, %v117_v34, %v114_v57  ;;  %v288_v48 = vpop.eup %287  ;;  %v132_v27 = vmul.f32 0.6931472, %v286_v15 }
  0x43   :  { %v184_v23 = vadd.f32 %v120_v8, %v56_v49  ;;  %v129_v26 = vsel %vm498_vm5, %v126_v43, %v123_v42  ;;  %v141_v29 = vmul.f32 0.6931472, %v288_v48  ;;  %v290_v34 = vpop.eup %289 }
  0x44   :  { %v185_v28 = vadd.f32 %v129_v26, %v57_v53  ;;  %v138_v49 = vsel %vm502_vm6, %v135_v62, %v132_v27  ;;  %v292_v39 = vpop.eup %291  ;;  %v150_v43 = vmul.f32 0.6931472, %v290_v34  ;;  %v217_v27 = vmul.f32 %v422_v44, %v409_v25 }
  0x45   :  { %v192_v35 = vsel %vm64_vm0, %v381_v5, %v184_v23  ;;  %v186_v5 = vadd.f32 %v138_v49, %v58_v58  ;;  %v147_v38 = vsel %vm506_vm7, %v144_v11, %v141_v29  ;;  %v159_v58 = vmul.f32 0.6931472, %v292_v39  ;;  %v294_v62 = vpop.eup %293 }
  0x46   :  { %v201_v53 = vmul.f32 %v427_v47, %v192_v35  ;;  %v193_v63 = vsel %vm65_vm1, %v384_v6, %v185_v28  ;;  %v187_v40 = vadd.f32 %v147_v38, %v59_v60  ;;  %v296_v9 = vpop.eup %295  ;;  %v168_v4 = vmul.f32 0.6931472, %v294_v62 }
  0x47   :  { %v202_v18 = vmul.f32 %v427_v47, %v193_v63  ;;  %v194_v6 = vsel %vm66_vm3, %v387_v7, %v186_v5  ;;  %v177_v15 = vmul.f32 0.6931472, %v296_v9  ;;  %v216_v23 = vmul.f32 %v422_v44, %v407_v24 }
  0x48   :  { %v218_v45 = vadd.f32 %v433_v50, %v201_v53  ;;  %v203_v57 = vmul.f32 %v427_v47, %v194_v6  ;;  %v195_v60 = vsel %vm67_vm4, %v393_v10, %v187_v40  ;;  %v156_v50 = vsel %vm518_vm9, %v153_v20, %v150_v43 }
  0x49   :  { %v219_v55 = vadd.f32 %v441_v54, %v202_v18  ;;  %v204_v7 = vmul.f32 %v427_v47, %v195_v60  ;;  %v188_v22 = vadd.f32 %v156_v50, %v60_v1  ;;  %v165_v54 = vsel %vm524_vm11, %v162_v32, %v159_v58 }
  0x4a   :  { %v227_v0 = vsub.f32 %v218_v45, %v436_v52  ;;  %v220_v11 = vadd.f32 %v449_v59, %v203_v57  ;;  %v189_v10 = vadd.f32 %v165_v54, %v61_v2  ;;  %v183_v46 = vsel %vm560_vm14, %v180_v51, %v177_v15 }
  0x4b   :  { %v228_v42 = vsub.f32 %v219_v55, %v436_v52  ;;  %v221_v13 = vadd.f32 %v454_v61, %v204_v7  ;;  %v196_v1 = vsel %vm68_vm8, %v399_v14, %v188_v22  ;;  %v174_v61 = vsel %vm544_vm13, %v171_v36, %v168_v4 }
  0x4c   :  { %235 = vst [vmem:[#allocation7] sm:$0xff] %v227_v0  ;;  %v229_v8 = vsub.f32 %v220_v11, %v436_v52  ;;  %v205_v59 = vmul.f32 %v427_v47, %v196_v1  ;;  %v197_v2 = vsel %vm69_vm10, %v404_v19, %v189_v10  ;;  %v190_v12 = vadd.f32 %v174_v61, %v62_v17 }
  0x4d   :  { %236 = vst [vmem:[#allocation7 + $0x8] sm:$0xff] %v228_v42  ;;  %v230_v20 = vsub.f32 %v221_v13, %v436_v52  ;;  %v206_v14 = vmul.f32 %v427_v47, %v197_v2  ;;  %v191_v19 = vadd.f32 %v183_v46, %v63_v21 }
  0x4e   :  { %237 = vst [vmem:[#allocation7 + $0x10] sm:$0xff] %v229_v8  ;;  %v222_v48 = vadd.f32 %v463_v3, %v205_v59  ;;  %v198_v17 = vsel %vm70_vm12, %v413_v30, %v190_v12 }
  0x4f   :  { %238 = vst [vmem:[#allocation7 + $0x18] sm:$0xff] %v230_v20  ;;  %v223_v26 = vadd.f32 %v471_v16, %v206_v14  ;;  %v207_v3 = vmul.f32 %v427_v47, %v198_v17  ;;  %v199_v24 = vsel %vm71_vm15, %v416_v31, %v191_v19 }
  0x50   :  { %v231_v56 = vsub.f32 %v222_v48, %v436_v52  ;;  %v208_v16 = vmul.f32 %v427_v47, %v199_v24 }
  0x51   :  { %v232_v21 = vsub.f32 %v223_v26, %v436_v52  ;;  %v224_v28 = vadd.f32 %v216_v23, %v207_v3 }
  0x52   :  { %239 = vst [vmem:[#allocation7 + $0x20] sm:$0xff] %v231_v56  ;;  %v225_v30 = vadd.f32 %v217_v27, %v208_v16 }
  0x53   :  { %240 = vst [vmem:[#allocation7 + $0x28] sm:$0xff] %v232_v21  ;;  %v233_v25 = vsub.f32 %v224_v28, %v436_v52 }
  0x54   :  { %v234_v44 = vsub.f32 %v225_v30, %v436_v52 }
  0x55   :  { %241 = vst [vmem:[#allocation7 + $0x30] sm:$0xff] %v233_v25 }
  0x56   :  { %242 = vst [vmem:[#allocation7 + $0x38] sm:$0xff] %v234_v44 }
  0x57   :  { %336 = shalt.err (!%p333_p9)
}
  0x58   :  { %252 = dma.vmem_to_hbm [thread:$0]  %s250_s20, 1024, %s636_s2, [#allocation4]  }
  0x59   :  { %349 = dma.done.wait [#allocation4], 1024  }
  0x5a   :  { %350 = vsyncadd [#allocation4], 4294966272 }
  0x5b   :  { %256 = vsyncpa [#allocation3], 1 }
  0x5c   :  { %257 = vsyncpa [#allocation4], 1 }
  0x5d   :  { %258 = vsyncpa [#allocation5], 1 }

</bundles_post_ra>
